<compile_context>
chip_gen: v5e
topology: v5e:2x2
jax: 0.10.0
libtpu: 0.0.40
codegen_flags: <defaults>
</compile_context>

<pallas_src>
import jax
import jax.numpy as jnp
from jax.experimental import pallas as pl
from jax.experimental.pallas import tpu as pltpu


_LANE = 128  # vreg lane width (last dim)


def _round_up(x, m):
    return ((x + m - 1) // m) * m


def _chomp_kernel(x_ref, o_ref):
    # Straight streaming copy.  The static prefix slice is a no-op on the
    # lane-dense tiled path (input and output tiles share the same width); it
    # only does real work in the tiny-sequence fallback where the input tile
    # carries the full (un-chomped) L axis.
    o_ref[...] = x_ref[:, : o_ref.shape[-1]]


def _vmem_budgets():
    """Returns (per-array block byte budget, vmem_limit_bytes) per generation."""
    vmem = None
    try:
        info = pltpu.get_tpu_info()
        vmem = getattr(info, "vmem_capacity_bytes", None)
    except Exception:
        vmem = None
    if vmem is not None and vmem >= 96 * 1024 * 1024:
        # v5e / v6e: 128 MiB physical VMEM -> larger blocks, generous limit.
        return 8 * 1024 * 1024, 64 * 1024 * 1024
    # v7x (64 MiB physical VMEM) or unknown: conservative but still large.
    return 6 * 1024 * 1024, 48 * 1024 * 1024


def _choose_tiles(r, l, l_out, itemsize, block_bytes):
    """Pick (tile_r, tile_l_in, tile_l_out) honoring the (8,128) block rules."""
    sub = 8 * max(1, 4 // itemsize)  # sublane pack: 8 f32, 16 bf16, 32 int8
    r_pad = _round_up(r, sub)

    if l_out >= _LANE:
        # Lane-dense tiled path: identical, 128-multiple tile widths for input
        # and output, so every block except a ragged edge is an unmasked copy.
        l_pad = _round_up(l_out, _LANE)
        max_lanes = max(_LANE, (block_bytes // (r_pad * itemsize)) // _LANE * _LANE)
        tile_l_in = tile_l_out = min(l_pad, max_lanes)
    else:
        # Tiny-sequence fallback: full-extent L blocks, prefix-slice in kernel.
        tile_l_in, tile_l_out = l, l_out

    # Row tile: always a multiple of the sublane granularity (ragged edges are
    # auto-masked), capped by the per-array block byte budget.
    max_rows = max(sub, (block_bytes // (max(tile_l_in, 1) * itemsize)) // sub * sub)
    tile_r = min(r_pad, max_rows)
    return tile_r, tile_l_in, tile_l_out


def chomp1d(x, chomp_size):
    """Pallas equivalent of Chomp1d(chomp_size)(x) for x of shape (N, C, L)."""
    n, c, l = x.shape
    l_out = l - chomp_size
    assert l_out > 0, "chomp_size must be smaller than the sequence length"

    # Flatten (N, C) into one row axis: free metadata reshape (adjacent dims),
    # gives full-sublane row tiles and a large parallel grid axis.
    r = n * c
    x2 = x.reshape(r, l)

    itemsize = jnp.dtype(x.dtype).itemsize
    block_bytes, vmem_limit = _vmem_budgets()
    tile_r, tile_l_in, tile_l_out = _choose_tiles(r, l, l_out, itemsize, block_bytes)

    grid = (pl.cdiv(r, tile_r), pl.cdiv(l_out, tile_l_out))

    out2 = pl.pallas_call(
        _chomp_kernel,
        out_shape=jax.ShapeDtypeStruct((r, l_out), x.dtype),
        grid=grid,
        in_specs=[pl.BlockSpec((tile_r, tile_l_in), lambda ri, li: (ri, li))],
        out_specs=pl.BlockSpec((tile_r, tile_l_out), lambda ri, li: (ri, li)),
        compiler_params=pltpu.CompilerParams(
            # Pure copy, no reduction: both axes independent -> both v7x
            # TensorCores get work (near-zero effect on 1-TC v5e/v6e).
            dimension_semantics=("parallel", "parallel"),
            vmem_limit_bytes=vmem_limit,
        ),
        cost_estimate=pl.CostEstimate(
            flops=0,
            transcendentals=0,
            bytes_accessed=2 * r * l_out * itemsize,
        ),
    )(x2)

    return out2.reshape(n, c, l_out)


if __name__ == "__main__":
    key = jax.random.PRNGKey(0)

    # --- Primary (spec-sized) test: (batch, channels, seq) TCN branch output.
    N, C, L = 2, 4, 16
    chomp_size = 4
    x = jax.random.normal(key, (N, C, L), dtype=jnp.float32)

    out = jax.block_until_ready(chomp1d(x, chomp_size))
    ref = x[:, :, : L - chomp_size]
    assert out.shape == (N, C, L - chomp_size), out.shape
    assert out.dtype == x.dtype
    assert jnp.array_equal(out, ref), "Pallas Chomp1d mismatch (small/unaligned path)"

    # --- Lane-dense tiled path with a ragged (masked) edge L block.
    k2 = jax.random.PRNGKey(1)
    x2 = jax.random.normal(k2, (2, 8, 210), dtype=jnp.float32)
    out2 = jax.block_until_ready(chomp1d(x2, 10))
    assert jnp.array_equal(out2, x2[:, :, :200]), "mismatch (tiled, masked edge)"

    # --- Lane-dense tiled path, 128-aligned L_out, non-multiple-of-8 row count.
    k3 = jax.random.PRNGKey(2)
    x3 = jax.random.normal(k3, (2, 6, 640), dtype=jnp.float32)
    out3 = jax.block_until_ready(chomp1d(x3, 128))
    assert jnp.array_equal(out3, x3[:, :, :512]), "mismatch (tiled, aligned)"

    print("KERNEL_OK")
</pallas_src>

<mosaic_0001>
module attributes {stable_mosaic.version = 11 : i64} {
  func.func @_chomp_kernel(%arg0: i32, %arg1: i32, %arg2: memref<8x16xf32, #tpu.memory_space<vmem>>, %arg3: memref<8x12xf32, #tpu.memory_space<vmem>>) attributes {dimension_semantics = [#tpu.dimension_semantics<parallel>, #tpu.dimension_semantics<parallel>], iteration_bounds = array<i64: 1, 1>, scalar_prefetch = 0 : i64, scratch_operands = 0 : i64, tpu.core_type = #tpu.core_type<tc>, window_params = [{transform_indices = @transform_0, window_bounds = array<i64: 8, 16>}, {transform_indices = @transform_1, window_bounds = array<i64: 8, 12>}]} {
    %c0 = arith.constant 0 : index
    %c0_0 = arith.constant 0 : index
    %0 = vector.load %arg2[%c0, %c0_0] : memref<8x16xf32, #tpu.memory_space<vmem>>, vector<8x12xf32>
    %c0_1 = arith.constant 0 : index
    %c0_2 = arith.constant 0 : index
    %1 = vector.load %arg3[%c0_1, %c0_2] : memref<8x12xf32, #tpu.memory_space<vmem>>, vector<8x12xf32>
    tpu.vector_store %arg3[%c0_1, %c0_2], %0 {strides = array<i32>} : memref<8x12xf32, #tpu.memory_space<vmem>>, vector<8x12xf32>,
    return
  }
  func.func @transform_0(%arg0: i32, %arg1: i32) -> (i32, i32) {
    %c0_i32 = arith.constant 0 : i32
    return %arg0, %arg1 : i32, i32
  }
  func.func @transform_1(%arg0: i32, %arg1: i32) -> (i32, i32) {
    %c0_i32 = arith.constant 0 : i32
    return %arg0, %arg1 : i32, i32
  }
}

</mosaic_0001>

<bundles_post_ra>
// kernel: tpu_custom_call.1
= control target key start
LH: loop header
LB: loop body
LE: loop exit
PB: predicated region body
PF: predicated region fallthrough
CT: control target
= control target key end

     0   :  { %6 = vsyncpa [#allocation3], 0  ;;  %s115_s0 = inlined_call_operand.hbm [shape: f32[8,16], index: 0, kind: input, shape index: {}]   ;;  %s116_s1 = inlined_call_operand.hbm [shape: f32[8,12], index: 1, kind: output, shape index: {}]  }
   0x1   :  { %7 = vsyncpa [#allocation4], 0  ;;  %s13_s8 = sshll.u32 %s115_s0, 4  ;;  %s97_s9 = smov [#allocation2]   ;;  %s14_s8 = int_to_ptr.hbm [resolvable:$true] %s13_s8 }
   0x2   :  { %s15_s10 = sshll.u32 %s97_s9, 4  ;;  %s16_s10 = int_to_ptr.vmem [resolvable:$true] %s15_s10 }
   0x3   :  { %18 = dma.hbm_to_vmem [thread:$0]  %s14_s8, 128, %s16_s10, [#allocation3]  }
   0x4   :  { %93 = dma.done.wait [#allocation3], 128  }
   0x5   :  { %94 = vsyncadd [#allocation3], 4294967168  ;;  %s98_s11 = smov [#allocation5]   ;;  %s33_s15 = sshll.u32 %s116_s1, 4  ;;  %vm24_vm0 = vcmask 97280   ;;  %v23_v0 = vld [vmem:[#allocation2] sm:$0xff]  ;;  %s34_s15 = int_to_ptr.hbm [resolvable:$true] %s33_s15 }
   0x6   :  { %s31_s12 = sshll.u32 %s98_s11, 4  ;;  %25 = vst.msk [vmem:[#allocation5] sm:$0xff] %vm24_vm0, %v23_v0  ;;  %s32_s12 = int_to_ptr.vmem [resolvable:$true] %s31_s12 }
   0x7   :  { %36 = dma.vmem_to_hbm [thread:$0]  %s32_s12, 128, %s34_s15, [#allocation4]  }
   0x8   :  { %95 = dma.done.wait [#allocation4], 128  }
   0x9   :  { %96 = vsyncadd [#allocation4], 4294967168 }
   0xa   :  { %41 = vsyncpa [#allocation3], 1 }
   0xb   :  { %42 = vsyncpa [#allocation4], 1 }

</bundles_post_ra>
